<compile_context>
chip_gen: v6e
topology: v6e:2x2x1
jax: 0.10.0
libtpu: 0.0.40
codegen_flags: <defaults>
</compile_context>

<pallas_src>
import jax
import jax.numpy as jnp
from jax.experimental import pallas as pl
from jax.experimental.pallas import tpu as pltpu

LANES = 128


def _round_up(x, m):
    return ((x + m - 1) // m) * m


def _sublane_multiple(*arrays):
    """Minimum legal second-to-last block dim: 8 (4-byte), 16 (2-byte), 32 (1-byte)."""
    sub = 8
    for a in arrays:
        item = jnp.dtype(a.dtype).itemsize
        sub = max(sub, 8 * max(1, 4 // max(1, item)))
    return sub


def _chip_config():
    """(n_split, max_tile_rows, vmem_limit_bytes) per TPU generation.

    n_split == 2 only where a second TensorCore exists to shard the 'parallel'
    axis onto (v7x); single-TC v5e/v6e get n_split == 1 (no wasted padding /
    doubled accumulator).
    """
    kind = ""
    try:
        kind = jax.devices()[0].device_kind.lower()
    except Exception:
        pass
    if "v7" in kind:
        return 2, 2048, 32 * 1024 * 1024      # 64 MiB VMEM/TC -> leave headroom
    if "v6" in kind:
        return 1, 4096, 48 * 1024 * 1024      # amortize ~0.35us/step against 1.4 TB/s HBM
    return 1, 2048, 32 * 1024 * 1024          # v5e & unknown: stay inside scoped VMEM


def _sublane_partial(x):
    """(T, 128) -> (8, 128) per-lane partial sums; T % 8 == 0 -> pure vreg adds."""
    t = x.shape[0]
    return x.reshape(t // 8, 8, LANES).sum(axis=0)


# --------------------------------------------------------------------------
# Kernel A: Dice/BCE statistics for the three prediction heads.
# Accumulator layout (10 stats, each an (8,128) lane-resident partial sum):
#   [0..2] combined: inter, p_sum, bce_sum
#   [3..5] b1:       inter, p_sum, bce_sum
#   [6..8] b2:       inter, p_sum, bce_sum
#   [9]    t_sum (computed once per tile)
# --------------------------------------------------------------------------
def _make_pred_stats_kernel(n_inner, tile_r, rows_full, lane_rem, needs_mask):
    def kernel(comb_ref, b1_ref, b2_ref, tgt_ref, acc_ref):
        @pl.when(pl.program_id(1) == 0)
        def _():
            acc_ref[...] = jnp.zeros_like(acc_ref)

        t = tgt_ref[...].astype(jnp.float32)

        if needs_mask:
            blk = pl.program_id(0) * n_inner + pl.program_id(1)
            ridx = jax.lax.broadcasted_iota(jnp.int32, (tile_r, LANES), 0) + blk * tile_r
            if lane_rem == 0:
                valid = ridx < rows_full
            else:
                lidx = jax.lax.broadcasted_iota(jnp.int32, (tile_r, LANES), 1)
                valid = (ridx < rows_full) | ((ridx == rows_full) & (lidx < lane_rem))
            t = jnp.where(valid, t, 0.0)          # exact-zero tail contribution
        else:
            valid = None

        idx = 0
        for ref in (comb_ref, b1_ref, b2_ref):
            x = ref[...].astype(jnp.float32)
            # 2 "real" EUP transcendentals/elem (exp, log1p); the approx
            # reciprocal rides the EUP slot nearly for free.
            e = jnp.exp(-jnp.abs(x))
            l1p = jnp.log1p(e)
            p = jnp.where(x >= 0.0, 1.0, e) * pl.reciprocal(1.0 + e, approx=True)
            bce = jnp.maximum(x, 0.0) - t * x + l1p     # one_minus_t temp eliminated
            if needs_mask:
                p = jnp.where(valid, p, 0.0)
                bce = jnp.where(valid, bce, 0.0)
            acc_ref[idx, :, :] = acc_ref[idx, :, :] + _sublane_partial(p * t)
            acc_ref[idx + 1, :, :] = acc_ref[idx + 1, :, :] + _sublane_partial(p)
            acc_ref[idx + 2, :, :] = acc_ref[idx + 2, :, :] + _sublane_partial(bce)
            idx += 3
        acc_ref[9, :, :] = acc_ref[9, :, :] + _sublane_partial(t)

    return kernel


def _pred_stats(comb, b1p, b2p, target, n_split, max_tile_r, vmem_limit):
    numel = int(target.size)
    sub = _sublane_multiple(comb, b1p, b2p, target)
    rows_full, lane_rem = divmod(numel, LANES)
    rows = rows_full + (1 if lane_rem else 0)

    if rows >= sub:
        tile_r = min(max_tile_r, (rows // sub) * sub)   # multiple of sub, <= rows
        arr_rows = rows
    else:                                               # tiny input: pad once (cheap)
        tile_r = sub
        arr_rows = sub

    flat_len = arr_rows * LANES

    def to_lanes(x):
        flat = x.reshape(-1)
        if flat_len != numel:      # only when lanes don't line up (tiny / ragged tail)
            flat = jnp.pad(flat, (0, flat_len - numel))
        return flat.reshape(arr_rows, LANES)            # pure view in the common case

    ops = [to_lanes(a) for a in (comb, b1p, b2p, target)]

    n_tiles = pl.cdiv(arr_rows, tile_r)
    ns = n_split if n_tiles >= 2 else 1
    n_inner = pl.cdiv(n_tiles, ns)
    covered = ns * n_inner * tile_r
    needs_mask = covered * LANES != numel
    max_blk = n_tiles - 1

    def blk_map(o, i):
        # clamp keeps every DMA window inside the array; overhang is masked in-kernel
        return (jnp.minimum(o * n_inner + i, max_blk), 0)

    kernel = _make_pred_stats_kernel(n_inner, tile_r, rows_full, lane_rem, needs_mask)

    stream_bytes = sum(int(a.size) * a.dtype.itemsize for a in ops)
    cost = pl.CostEstimate(flops=50 * numel, transcendentals=9 * numel,
                           bytes_accessed=stream_bytes + ns * 10 * 8 * LANES * 4)

    in_spec = pl.BlockSpec((tile_r, LANES), blk_map)
    stats_blk = pl.pallas_call(
        kernel,
        out_shape=jax.ShapeDtypeStruct((ns, 10, 8, LANES), jnp.float32),
        grid_spec=pltpu.PrefetchScalarGridSpec(
            num_scalar_prefetch=0,
            grid=(ns, n_inner),
            in_specs=[in_spec, in_spec, in_spec, in_spec],
            out_specs=pl.BlockSpec((None, 10, 8, LANES), lambda o, i: (o, 0, 0, 0)),
        ),
        compiler_params=pltpu.CompilerParams(
            dimension_semantics=("parallel", "arbitrary"),
            vmem_limit_bytes=vmem_limit),
        cost_estimate=cost,
    )(*ops)
    return stats_blk.sum(axis=(0, 2, 3)), numel          # (10,) tiny JAX epilogue


# --------------------------------------------------------------------------
# Kernel B: consistency MSE numerator
#   sum ||cf_half0 - 0.7*b1f||^2 + ||cf_half1 - 0.3*b2f||^2
# cf is viewed as (B, 2, f_rows, 128); the grid iterates the flattened
# (batch x row-tile) space so the parallel split is independent of B.
# --------------------------------------------------------------------------
def _make_consistency_kernel(n_inner, n_rf, tile_rf, f_rows, n_total, needs_mask):
    def kernel(cf_ref, b1_ref, b2_ref, acc_ref):
        @pl.when(pl.program_id(1) == 0)
        def _():
            acc_ref[...] = jnp.zeros_like(acc_ref)
        d1 = cf_ref[0].astype(jnp.float32) - 0.7 * b1_ref[...].astype(jnp.float32)
        d2 = cf_ref[1].astype(jnp.float32) - 0.3 * b2_ref[...].astype(jnp.float32)
        sq = d1 * d1 + d2 * d2
        if needs_mask:
            flat = pl.program_id(0) * n_inner + pl.program_id(1)
            r = flat % n_rf
            ridx = jax.lax.broadcasted_iota(jnp.int32, (tile_rf, LANES), 0) + r * tile_rf
            sq = jnp.where((flat < n_total) & (ridx < f_rows), sq, 0.0)
        acc_ref[...] += _sublane_partial(sq)
    return kernel


def _consistency_mse(cf, b1f, b2f, n_split, vmem_limit, max_tile_rf=1024):
    B = cf.shape[0]
    f_half = int(b1f.shape[1]) * int(b1f.shape[2]) * int(b1f.shape[3])
    f_rows = f_half // LANES
    sub = _sublane_multiple(cf, b1f, b2f)
    tile_rf = min(max_tile_rf, (f_rows // sub) * sub)    # fixed large tile, never tiny

    cf_r = cf.reshape(B, 2, f_rows, LANES)               # contiguous views, no HBM copies
    b1_r = b1f.reshape(B, f_rows, LANES)
    b2_r = b2f.reshape(B, f_rows, LANES)

    n_rf = pl.cdiv(f_rows, tile_rf)
    n_total = B * n_rf
    ns = n_split if n_total >= 2 else 1
    n_inner = pl.cdiv(n_total, ns)
    needs_mask = (ns * n_inner != n_total) or (n_rf * tile_rf != f_rows)

    def cf_map(o, i):
        flat = jnp.minimum(o * n_inner + i, n_total - 1)
        return (flat // n_rf, 0, flat % n_rf, 0)

    def f_map(o, i):
        flat = jnp.minimum(o * n_inner + i, n_total - 1)
        return (flat // n_rf, flat % n_rf, 0)

    kernel = _make_consistency_kernel(n_inner, n_rf, tile_rf, f_rows, n_total, needs_mask)

    bytes_in = sum(int(a.size) * a.dtype.itemsize for a in (cf_r, b1_r, b2_r))
    cost = pl.CostEstimate(flops=8 * int(cf.size), transcendentals=0,
                           bytes_accessed=bytes_in + ns * 8 * LANES * 4)

    out = pl.pallas_call(
        kernel,
        out_shape=jax.ShapeDtypeStruct((ns, 8, LANES), jnp.float32),
        grid_spec=pltpu.PrefetchScalarGridSpec(
            num_scalar_prefetch=0,
            grid=(ns, n_inner),
            in_specs=[pl.BlockSpec((None, 2, tile_rf, LANES), cf_map),
                      pl.BlockSpec((None, tile_rf, LANES), f_map),
                      pl.BlockSpec((None, tile_rf, LANES), f_map)],
            out_specs=pl.BlockSpec((None, 8, LANES), lambda o, i: (o, 0, 0)),
        ),
        compiler_params=pltpu.CompilerParams(
            dimension_semantics=("parallel", "arbitrary"),
            vmem_limit_bytes=vmem_limit),
        cost_estimate=cost,
    )(cf_r, b1_r, b2_r)
    return out.sum() / float(cf.size)


# --------------------------------------------------------------------------
# Forward pass (DualBackboneLoss semantics)
# --------------------------------------------------------------------------
def dual_backbone_loss(outputs, target, b1_weight=0.3, b2_weight=0.2,
                       combined_weight=0.5, smooth=1.0):
    if target.ndim == 3:
        target = target[:, None, :, :]          # unsqueeze(1)
    batch = target.shape[0]
    tgt_hw = target.shape[-2:]

    n_split, max_tile_r, vmem_limit = _chip_config()

    preds = []
    for name in ('combined_pred', 'b1_pred', 'b2_pred'):
        p = outputs[name]
        if p.shape[-2:] != tgt_hw:
            # F.interpolate(mode='bilinear', align_corners=False) equivalent (host-side XLA).
            p = jax.image.resize(p, (*p.shape[:2], *tgt_hw), method='bilinear',
                                 antialias=False)
        if p.shape[0] != batch:
            p = p[:batch]
        preds.append(p)

    stats, numel = _pred_stats(preds[0], preds[1], preds[2], target,
                               n_split, max_tile_r, vmem_limit)
    tsum = stats[9]
    inv_n = 1.0 / float(numel)

    def dice_bce(i):
        inter, psum, bsum = stats[3 * i], stats[3 * i + 1], stats[3 * i + 2]
        bce = bsum * inv_n
        dice = 1.0 - (2.0 * inter + smooth) / (psum + tsum + smooth)
        return bce + dice

    combined_loss = dice_bce(0)
    b1_loss = dice_bce(1)
    b2_loss = dice_bce(2)

    total_loss = (combined_weight * combined_loss
                  + b1_weight * b1_loss
                  + b2_weight * b2_loss)
    loss_components = {'combined_loss': combined_loss,
                       'b1_loss': b1_loss,
                       'b2_loss': b2_loss}

    # ---------------- consistency (feature MSE) ----------------
    b1f = outputs['b1_features']
    b2f = outputs['b2_features']
    cf = outputs['combined_features']
    mb = min(b1f.shape[0], b2f.shape[0], cf.shape[0], batch)
    b1f, b2f, cf = b1f[:mb], b2f[:mb], cf[:mb]

    consistency_loss = None
    if b1f.shape[-2:] == cf.shape[-2:]:
        if b2f.shape[-2:] != b1f.shape[-2:]:
            H2, W2 = b2f.shape[-2:]
            H1, W1 = b1f.shape[-2:]
            if H2 % H1 == 0 and W2 % W1 == 0:
                # adaptive_avg_pool2d with integer bins == reshape-mean pooling.
                b2f = b2f.reshape(mb, b2f.shape[1], H1, H2 // H1, W1, W2 // W1).mean(axis=(3, 5))
            # TODO(synk): general (non-integer-bin) adaptive_avg_pool2d is not implemented.

        if (b2f.shape[-2:] == b1f.shape[-2:]
                and cf.shape[1] == b1f.shape[1] + b2f.shape[1]):
            f_half = int(b1f.shape[1]) * int(b1f.shape[2]) * int(b1f.shape[3])
            sub_f = _sublane_multiple(cf, b1f, b2f)
            if (b1f.shape == b2f.shape and f_half % LANES == 0
                    and f_half // LANES >= sub_f):
                consistency_loss = _consistency_mse(cf, b1f, b2f, n_split, vmem_limit)
            else:
                # TODO(synk): non-lane-aligned / asymmetric-channel feature sizes fall
                # back to plain fused XLA for this small MSE term.
                wf = jnp.concatenate([0.7 * b1f.astype(jnp.float32),
                                      0.3 * b2f.astype(jnp.float32)], axis=1)
                consistency_loss = jnp.mean((cf.astype(jnp.float32) - wf) ** 2)

    if consistency_loss is not None:
        total_loss = total_loss + 0.1 * consistency_loss
        loss_components['consistency_loss'] = consistency_loss

    loss_components['total_loss'] = total_loss
    return total_loss, loss_components


# ---------------------------- pure-JAX reference ----------------------------
def _reference(outputs, target, b1_weight=0.3, b2_weight=0.2, combined_weight=0.5,
               smooth=1.0):
    if target.ndim == 3:
        target = target[:, None]
    t = target.astype(jnp.float32)

    def dice_bce(x):
        x = x.astype(jnp.float32)
        p = jax.nn.sigmoid(x)
        bce = jnp.mean(jnp.maximum(x, 0.0) - x * t + jnp.log1p(jnp.exp(-jnp.abs(x))))
        inter = jnp.sum(p * t)
        dice = 1.0 - (2.0 * inter + smooth) / (jnp.sum(p) + jnp.sum(t) + smooth)
        return bce + dice

    cl = dice_bce(outputs['combined_pred'])
    l1 = dice_bce(outputs['b1_pred'])
    l2 = dice_bce(outputs['b2_pred'])
    wf = jnp.concatenate([0.7 * outputs['b1_features'].astype(jnp.float32),
                          0.3 * outputs['b2_features'].astype(jnp.float32)], axis=1)
    cons = jnp.mean((outputs['combined_features'].astype(jnp.float32) - wf) ** 2)
    return combined_weight * cl + b1_weight * l1 + b2_weight * l2 + 0.1 * cons


if __name__ == "__main__":
    key = jax.random.PRNGKey(0)
    ks = jax.random.split(key, 7)
    B, H, W = 2, 16, 16          # predictions / target: (B, 1, H, W)
    C, h, w = 4, 16, 16          # features: b1/b2 (B, C, h, w); combined (B, 2C, h, w)

    outputs = {
        'combined_pred':     jax.random.normal(ks[0], (B, 1, H, W), jnp.float32),
        'b1_pred':           jax.random.normal(ks[1], (B, 1, H, W), jnp.float32),
        'b2_pred':           jax.random.normal(ks[2], (B, 1, H, W), jnp.float32),
        'b1_features':       jax.random.normal(ks[3], (B, C, h, w), jnp.float32),
        'b2_features':       jax.random.normal(ks[4], (B, C, h, w), jnp.float32),
        'combined_features': jax.random.normal(ks[5], (B, 2 * C, h, w), jnp.float32),
    }
    target = (jax.random.uniform(ks[6], (B, H, W)) > 0.5).astype(jnp.float32)

    total, comps = dual_backbone_loss(outputs, target)
    total = jax.block_until_ready(total)

    ref_total = _reference(outputs, target)
    err = float(jnp.abs(total - ref_total))
    tol = 3e-3 * (1.0 + abs(float(ref_total)))   # headroom for approx-reciprocal sigmoid
    if err > tol:
        raise AssertionError(
            f"kernel/ref mismatch: {float(total)} vs {float(ref_total)} (|err|={err})")

    print("KERNEL_OK")
</pallas_src>

<mosaic_0001>
module attributes {stable_mosaic.version = 11 : i64} {
  func.func @kernel(%arg0: i32, %arg1: i32, %arg2: memref<8x128xf32, #tpu.memory_space<vmem>>, %arg3: memref<8x128xf32, #tpu.memory_space<vmem>>, %arg4: memref<8x128xf32, #tpu.memory_space<vmem>>, %arg5: memref<8x128xf32, #tpu.memory_space<vmem>>, %arg6: memref<1x10x8x128xf32, #tpu.memory_space<vmem>>) attributes {dimension_semantics = [#tpu.dimension_semantics<parallel>, #tpu.dimension_semantics<arbitrary>], iteration_bounds = array<i64: 1, 1>, scalar_prefetch = 0 : i64, scratch_operands = 0 : i64, tpu.core_type = #tpu.core_type<tc>, window_params = [{transform_indices = @transform_0, window_bounds = array<i64: 8, 128>}, {transform_indices = @transform_1, window_bounds = array<i64: 8, 128>}, {transform_indices = @transform_2, window_bounds = array<i64: 8, 128>}, {transform_indices = @transform_3, window_bounds = array<i64: 8, 128>}, {transform_indices = @transform_4, window_bounds = array<i64: 1, 10, 8, 128>}]} {
    %c0_i32 = arith.constant 0 : i32
    %0 = arith.cmpi eq, %arg1, %c0_i32 : i32
    %1 = arith.extui %0 : i1 to i32
    %c0_i32_0 = arith.constant 0 : i32
    %2 = arith.cmpi ne, %1, %c0_i32_0 : i32
    scf.if %2 {
      %cst_110 = arith.constant 0.000000e+00 : f32
      %166 = vector.broadcast %cst_110 : f32 to vector<10x8x128xf32>
      %c0_111 = arith.constant 0 : index
      %c0_112 = arith.constant 0 : index
      %c0_113 = arith.constant 0 : index
      %c0_114 = arith.constant 0 : index
      %167 = vector.load %arg6[%c0_111, %c0_112, %c0_113, %c0_114] : memref<1x10x8x128xf32, #tpu.memory_space<vmem>>, vector<1x10x8x128xf32>
      %168 = vector.shape_cast %167 : vector<1x10x8x128xf32> to vector<10x8x128xf32>
      %169 = vector.shape_cast %166 : vector<10x8x128xf32> to vector<1x10x8x128xf32>
      tpu.vector_store %arg6[%c0_111, %c0_112, %c0_113, %c0_114], %169 {strides = array<i32>} : memref<1x10x8x128xf32, #tpu.memory_space<vmem>>, vector<1x10x8x128xf32>,
    } else {
    }
    %c0 = arith.constant 0 : index
    %c0_1 = arith.constant 0 : index
    %3 = vector.load %arg5[%c0, %c0_1] : memref<8x128xf32, #tpu.memory_space<vmem>>, vector<8x128xf32>
    %c1_i32 = arith.constant 1 : i32
    %4 = arith.muli %arg0, %c1_i32 : i32
    %5 = arith.addi %4, %arg1 : i32
    %6 = tpu.iota {dimensions = array<i32: 0>} : vector<8x128xi32>
    %c8_i32 = arith.constant 8 : i32
    %7 = arith.muli %5, %c8_i32 : i32
    %8 = vector.broadcast %7 : i32 to vector<8x128xi32>
    %9 = arith.addi %6, %8 : vector<8x128xi32>
    %c4_i32 = arith.constant 4 : i32
    %10 = vector.broadcast %c4_i32 : i32 to vector<8x128xi32>
    %11 = arith.cmpi slt, %9, %10 : vector<8x128xi32>
    %cst = arith.constant 0.000000e+00 : f32
    %12 = vector.broadcast %cst : f32 to vector<8x128xf32>
    %13 = arith.select %11, %3, %12 : vector<8x128xi1>, vector<8x128xf32>
    %c0_2 = arith.constant 0 : index
    %c0_3 = arith.constant 0 : index
    %14 = vector.load %arg2[%c0_2, %c0_3] : memref<8x128xf32, #tpu.memory_space<vmem>>, vector<8x128xf32>
    %15 = math.absf %14 : vector<8x128xf32>
    %cst_4 = arith.constant 0.000000e+00 : f32
    %16 = vector.broadcast %cst_4 : f32 to vector<8x128xf32>
    %17 = arith.subf %16, %15 : vector<8x128xf32>
    %18 = math.exp %17 : vector<8x128xf32>
    %19 = math.log1p %18 : vector<8x128xf32>
    %cst_5 = arith.constant 0.000000e+00 : f32
    %20 = vector.broadcast %cst_5 : f32 to vector<8x128xf32>
    %21 = arith.cmpf oge, %14, %20 : vector<8x128xf32>
    %cst_6 = arith.constant 1.000000e+00 : f32
    %22 = vector.broadcast %cst_6 : f32 to vector<8x128xf32>
    %23 = arith.select %21, %22, %18 : vector<8x128xi1>, vector<8x128xf32>
    %cst_7 = arith.constant 1.000000e+00 : f32
    %24 = vector.broadcast %cst_7 : f32 to vector<8x128xf32>
    %25 = arith.addf %24, %18 : vector<8x128xf32>
    %26 = tpu.reciprocal %25 {approx = true} : vector<8x128xf32> -> vector<8x128xf32>
    %27 = arith.mulf %23, %26 : vector<8x128xf32>
    %cst_8 = arith.constant 0.000000e+00 : f32
    %28 = vector.broadcast %cst_8 : f32 to vector<8x128xf32>
    %29 = arith.maximumf %14, %28 : vector<8x128xf32>
    %30 = arith.mulf %13, %14 : vector<8x128xf32>
    %31 = arith.subf %29, %30 : vector<8x128xf32>
    %32 = arith.addf %31, %19 : vector<8x128xf32>
    %cst_9 = arith.constant 0.000000e+00 : f32
    %33 = vector.broadcast %cst_9 : f32 to vector<8x128xf32>
    %34 = arith.select %11, %27, %33 : vector<8x128xi1>, vector<8x128xf32>
    %cst_10 = arith.constant 0.000000e+00 : f32
    %35 = vector.broadcast %cst_10 : f32 to vector<8x128xf32>
    %36 = arith.select %11, %32, %35 : vector<8x128xi1>, vector<8x128xf32>
    %c0_11 = arith.constant 0 : index
    %c0_12 = arith.constant 0 : index
    %c0_13 = arith.constant 0 : index
    %c0_14 = arith.constant 0 : index
    %37 = vector.load %arg6[%c0_11, %c0_12, %c0_13, %c0_14] : memref<1x10x8x128xf32, #tpu.memory_space<vmem>>, vector<1x1x8x128xf32>
    %38 = vector.shape_cast %37 : vector<1x1x8x128xf32> to vector<8x128xf32>
    %39 = arith.mulf %34, %13 : vector<8x128xf32>
    %40 = vector.shape_cast %39 : vector<8x128xf32> to vector<1x8x128xf32>
    %cst_15 = arith.constant dense<0.000000e+00> : vector<8x128xf32>
    %41 = vector.multi_reduction <add>, %40, %cst_15 [0] : vector<1x8x128xf32> to vector<8x128xf32>
    %42 = arith.addf %38, %41 : vector<8x128xf32>
    %c0_16 = arith.constant 0 : index
    %c0_17 = arith.constant 0 : index
    %c0_18 = arith.constant 0 : index
    %c0_19 = arith.constant 0 : index
    %43 = vector.load %arg6[%c0_16, %c0_17, %c0_18, %c0_19] : memref<1x10x8x128xf32, #tpu.memory_space<vmem>>, vector<1x1x8x128xf32>
    %44 = vector.shape_cast %43 : vector<1x1x8x128xf32> to vector<8x128xf32>
    %45 = vector.shape_cast %42 : vector<8x128xf32> to vector<1x1x8x128xf32>
    tpu.vector_store %arg6[%c0_16, %c0_17, %c0_18, %c0_19], %45 {strides = array<i32>} : memref<1x10x8x128xf32, #tpu.memory_space<vmem>>, vector<1x1x8x128xf32>,
    %c0_20 = arith.constant 0 : index
    %c1 = arith.constant 1 : index
    %c0_21 = arith.constant 0 : index
    %c0_22 = arith.constant 0 : index
    %46 = vector.load %arg6[%c0_20, %c1, %c0_21, %c0_22] : memref<1x10x8x128xf32, #tpu.memory_space<vmem>>, vector<1x1x8x128xf32>
    %47 = vector.shape_cast %46 : vector<1x1x8x128xf32> to vector<8x128xf32>
    %48 = vector.shape_cast %34 : vector<8x128xf32> to vector<1x8x128xf32>
    %cst_23 = arith.constant dense<0.000000e+00> : vector<8x128xf32>
    %49 = vector.multi_reduction <add>, %48, %cst_23 [0] : vector<1x8x128xf32> to vector<8x128xf32>
    %50 = arith.addf %47, %49 : vector<8x128xf32>
    %c0_24 = arith.constant 0 : index
    %c1_25 = arith.constant 1 : index
    %c0_26 = arith.constant 0 : index
    %c0_27 = arith.constant 0 : index
    %51 = vector.load %arg6[%c0_24, %c1_25, %c0_26, %c0_27] : memref<1x10x8x128xf32, #tpu.memory_space<vmem>>, vector<1x1x8x128xf32>
    %52 = vector.shape_cast %51 : vector<1x1x8x128xf32> to vector<8x128xf32>
    %53 = vector.shape_cast %50 : vector<8x128xf32> to vector<1x1x8x128xf32>
    tpu.vector_store %arg6[%c0_24, %c1_25, %c0_26, %c0_27], %53 {strides = array<i32>} : memref<1x10x8x128xf32, #tpu.memory_space<vmem>>, vector<1x1x8x128xf32>,
    %c0_28 = arith.constant 0 : index
    %c2 = arith.constant 2 : index
    %c0_29 = arith.constant 0 : index
    %c0_30 = arith.constant 0 : index
    %54 = vector.load %arg6[%c0_28, %c2, %c0_29, %c0_30] : memref<1x10x8x128xf32, #tpu.memory_space<vmem>>, vector<1x1x8x128xf32>
    %55 = vector.shape_cast %54 : vector<1x1x8x128xf32> to vector<8x128xf32>
    %56 = vector.shape_cast %36 : vector<8x128xf32> to vector<1x8x128xf32>
    %cst_31 = arith.constant dense<0.000000e+00> : vector<8x128xf32>
    %57 = vector.multi_reduction <add>, %56, %cst_31 [0] : vector<1x8x128xf32> to vector<8x128xf32>
    %58 = arith.addf %55, %57 : vector<8x128xf32>
    %c0_32 = arith.constant 0 : index
    %c2_33 = arith.constant 2 : index
    %c0_34 = arith.constant 0 : index
    %c0_35 = arith.constant 0 : index
    %59 = vector.load %arg6[%c0_32, %c2_33, %c0_34, %c0_35] : memref<1x10x8x128xf32, #tpu.memory_space<vmem>>, vector<1x1x8x128xf32>
    %60 = vector.shape_cast %59 : vector<1x1x8x128xf32> to vector<8x128xf32>
    %61 = vector.shape_cast %58 : vector<8x128xf32> to vector<1x1x8x128xf32>
    tpu.vector_store %arg6[%c0_32, %c2_33, %c0_34, %c0_35], %61 {strides = array<i32>} : memref<1x10x8x128xf32, #tpu.memory_space<vmem>>, vector<1x1x8x128xf32>,
    %c0_36 = arith.constant 0 : index
    %c0_37 = arith.constant 0 : index
    %62 = vector.load %arg3[%c0_36, %c0_37] : memref<8x128xf32, #tpu.memory_space<vmem>>, vector<8x128xf32>
    %63 = math.absf %62 : vector<8x128xf32>
    %cst_38 = arith.constant 0.000000e+00 : f32
    %64 = vector.broadcast %cst_38 : f32 to vector<8x128xf32>
    %65 = arith.subf %64, %63 : vector<8x128xf32>
    %66 = math.exp %65 : vector<8x128xf32>
    %67 = math.log1p %66 : vector<8x128xf32>
    %cst_39 = arith.constant 0.000000e+00 : f32
    %68 = vector.broadcast %cst_39 : f32 to vector<8x128xf32>
    %69 = arith.cmpf oge, %62, %68 : vector<8x128xf32>
    %cst_40 = arith.constant 1.000000e+00 : f32
    %70 = vector.broadcast %cst_40 : f32 to vector<8x128xf32>
    %71 = arith.select %69, %70, %66 : vector<8x128xi1>, vector<8x128xf32>
    %cst_41 = arith.constant 1.000000e+00 : f32
    %72 = vector.broadcast %cst_41 : f32 to vector<8x128xf32>
    %73 = arith.addf %72, %66 : vector<8x128xf32>
    %74 = tpu.reciprocal %73 {approx = true} : vector<8x128xf32> -> vector<8x128xf32>
    %75 = arith.mulf %71, %74 : vector<8x128xf32>
    %cst_42 = arith.constant 0.000000e+00 : f32
    %76 = vector.broadcast %cst_42 : f32 to vector<8x128xf32>
    %77 = arith.maximumf %62, %76 : vector<8x128xf32>
    %78 = arith.mulf %13, %62 : vector<8x128xf32>
    %79 = arith.subf %77, %78 : vector<8x128xf32>
    %80 = arith.addf %79, %67 : vector<8x128xf32>
    %cst_43 = arith.constant 0.000000e+00 : f32
    %81 = vector.broadcast %cst_43 : f32 to vector<8x128xf32>
    %82 = arith.select %11, %75, %81 : vector<8x128xi1>, vector<8x128xf32>
    %cst_44 = arith.constant 0.000000e+00 : f32
    %83 = vector.broadcast %cst_44 : f32 to vector<8x128xf32>
    %84 = arith.select %11, %80, %83 : vector<8x128xi1>, vector<8x128xf32>
    %c0_45 = arith.constant 0 : index
    %c3 = arith.constant 3 : index
    %c0_46 = arith.constant 0 : index
    %c0_47 = arith.constant 0 : index
    %85 = vector.load %arg6[%c0_45, %c3, %c0_46, %c0_47] : memref<1x10x8x128xf32, #tpu.memory_space<vmem>>, vector<1x1x8x128xf32>
    %86 = vector.shape_cast %85 : vector<1x1x8x128xf32> to vector<8x128xf32>
    %87 = arith.mulf %82, %13 : vector<8x128xf32>
    %88 = vector.shape_cast %87 : vector<8x128xf32> to vector<1x8x128xf32>
    %cst_48 = arith.constant dense<0.000000e+00> : vector<8x128xf32>
    %89 = vector.multi_reduction <add>, %88, %cst_48 [0] : vector<1x8x128xf32> to vector<8x128xf32>
    %90 = arith.addf %86, %89 : vector<8x128xf32>
    %c0_49 = arith.constant 0 : index
    %c3_50 = arith.constant 3 : index
    %c0_51 = arith.constant 0 : index
    %c0_52 = arith.constant 0 : index
    %91 = vector.load %arg6[%c0_49, %c3_50, %c0_51, %c0_52] : memref<1x10x8x128xf32, #tpu.memory_space<vmem>>, vector<1x1x8x128xf32>
    %92 = vector.shape_cast %91 : vector<1x1x8x128xf32> to vector<8x128xf32>
    %93 = vector.shape_cast %90 : vector<8x128xf32> to vector<1x1x8x128xf32>
    tpu.vector_store %arg6[%c0_49, %c3_50, %c0_51, %c0_52], %93 {strides = array<i32>} : memref<1x10x8x128xf32, #tpu.memory_space<vmem>>, vector<1x1x8x128xf32>,
    %c0_53 = arith.constant 0 : index
    %c4 = arith.constant 4 : index
    %c0_54 = arith.constant 0 : index
    %c0_55 = arith.constant 0 : index
    %94 = vector.load %arg6[%c0_53, %c4, %c0_54, %c0_55] : memref<1x10x8x128xf32, #tpu.memory_space<vmem>>, vector<1x1x8x128xf32>
    %95 = vector.shape_cast %94 : vector<1x1x8x128xf32> to vector<8x128xf32>
    %96 = vector.shape_cast %82 : vector<8x128xf32> to vector<1x8x128xf32>
    %cst_56 = arith.constant dense<0.000000e+00> : vector<8x128xf32>
    %97 = vector.multi_reduction <add>, %96, %cst_56 [0] : vector<1x8x128xf32> to vector<8x128xf32>
    %98 = arith.addf %95, %97 : vector<8x128xf32>
    %c0_57 = arith.constant 0 : index
    %c4_58 = arith.constant 4 : index
    %c0_59 = arith.constant 0 : index
    %c0_60 = arith.constant 0 : index
    %99 = vector.load %arg6[%c0_57, %c4_58, %c0_59, %c0_60] : memref<1x10x8x128xf32, #tpu.memory_space<vmem>>, vector<1x1x8x128xf32>
    %100 = vector.shape_cast %99 : vector<1x1x8x128xf32> to vector<8x128xf32>
    %101 = vector.shape_cast %98 : vector<8x128xf32> to vector<1x1x8x128xf32>
    tpu.vector_store %arg6[%c0_57, %c4_58, %c0_59, %c0_60], %101 {strides = array<i32>} : memref<1x10x8x128xf32, #tpu.memory_space<vmem>>, vector<1x1x8x128xf32>,
    %c0_61 = arith.constant 0 : index
    %c5 = arith.constant 5 : index
    %c0_62 = arith.constant 0 : index
    %c0_63 = arith.constant 0 : index
    %102 = vector.load %arg6[%c0_61, %c5, %c0_62, %c0_63] : memref<1x10x8x128xf32, #tpu.memory_space<vmem>>, vector<1x1x8x128xf32>
    %103 = vector.shape_cast %102 : vector<1x1x8x128xf32> to vector<8x128xf32>
    %104 = vector.shape_cast %84 : vector<8x128xf32> to vector<1x8x128xf32>
    %cst_64 = arith.constant dense<0.000000e+00> : vector<8x128xf32>
    %105 = vector.multi_reduction <add>, %104, %cst_64 [0] : vector<1x8x128xf32> to vector<8x128xf32>
    %106 = arith.addf %103, %105 : vector<8x128xf32>
    %c0_65 = arith.constant 0 : index
    %c5_66 = arith.constant 5 : index
    %c0_67 = arith.constant 0 : index
    %c0_68 = arith.constant 0 : index
    %107 = vector.load %arg6[%c0_65, %c5_66, %c0_67, %c0_68] : memref<1x10x8x128xf32, #tpu.memory_space<vmem>>, vector<1x1x8x128xf32>
    %108 = vector.shape_cast %107 : vector<1x1x8x128xf32> to vector<8x128xf32>
    %109 = vector.shape_cast %106 : vector<8x128xf32> to vector<1x1x8x128xf32>
    tpu.vector_store %arg6[%c0_65, %c5_66, %c0_67, %c0_68], %109 {strides = array<i32>} : memref<1x10x8x128xf32, #tpu.memory_space<vmem>>, vector<1x1x8x128xf32>,
    %c0_69 = arith.constant 0 : index
    %c0_70 = arith.constant 0 : index
    %110 = vector.load %arg4[%c0_69, %c0_70] : memref<8x128xf32, #tpu.memory_space<vmem>>, vector<8x128xf32>
    %111 = math.absf %110 : vector<8x128xf32>
    %cst_71 = arith.constant 0.000000e+00 : f32
    %112 = vector.broadcast %cst_71 : f32 to vector<8x128xf32>
    %113 = arith.subf %112, %111 : vector<8x128xf32>
    %114 = math.exp %113 : vector<8x128xf32>
    %115 = math.log1p %114 : vector<8x128xf32>
    %cst_72 = arith.constant 0.000000e+00 : f32
    %116 = vector.broadcast %cst_72 : f32 to vector<8x128xf32>
    %117 = arith.cmpf oge, %110, %116 : vector<8x128xf32>
    %cst_73 = arith.constant 1.000000e+00 : f32
    %118 = vector.broadcast %cst_73 : f32 to vector<8x128xf32>
    %119 = arith.select %117, %118, %114 : vector<8x128xi1>, vector<8x128xf32>
    %cst_74 = arith.constant 1.000000e+00 : f32
    %120 = vector.broadcast %cst_74 : f32 to vector<8x128xf32>
    %121 = arith.addf %120, %114 : vector<8x128xf32>
    %122 = tpu.reciprocal %121 {approx = true} : vector<8x128xf32> -> vector<8x128xf32>
    %123 = arith.mulf %119, %122 : vector<8x128xf32>
    %cst_75 = arith.constant 0.000000e+00 : f32
    %124 = vector.broadcast %cst_75 : f32 to vector<8x128xf32>
    %125 = arith.maximumf %110, %124 : vector<8x128xf32>
    %126 = arith.mulf %13, %110 : vector<8x128xf32>
    %127 = arith.subf %125, %126 : vector<8x128xf32>
    %128 = arith.addf %127, %115 : vector<8x128xf32>
    %cst_76 = arith.constant 0.000000e+00 : f32
    %129 = vector.broadcast %cst_76 : f32 to vector<8x128xf32>
    %130 = arith.select %11, %123, %129 : vector<8x128xi1>, vector<8x128xf32>
    %cst_77 = arith.constant 0.000000e+00 : f32
    %131 = vector.broadcast %cst_77 : f32 to vector<8x128xf32>
    %132 = arith.select %11, %128, %131 : vector<8x128xi1>, vector<8x128xf32>
    %c0_78 = arith.constant 0 : index
    %c6 = arith.constant 6 : index
    %c0_79 = arith.constant 0 : index
    %c0_80 = arith.constant 0 : index
    %133 = vector.load %arg6[%c0_78, %c6, %c0_79, %c0_80] : memref<1x10x8x128xf32, #tpu.memory_space<vmem>>, vector<1x1x8x128xf32>
    %134 = vector.shape_cast %133 : vector<1x1x8x128xf32> to vector<8x128xf32>
    %135 = arith.mulf %130, %13 : vector<8x128xf32>
    %136 = vector.shape_cast %135 : vector<8x128xf32> to vector<1x8x128xf32>
    %cst_81 = arith.constant dense<0.000000e+00> : vector<8x128xf32>
    %137 = vector.multi_reduction <add>, %136, %cst_81 [0] : vector<1x8x128xf32> to vector<8x128xf32>
    %138 = arith.addf %134, %137 : vector<8x128xf32>
    %c0_82 = arith.constant 0 : index
    %c6_83 = arith.constant 6 : index
    %c0_84 = arith.constant 0 : index
    %c0_85 = arith.constant 0 : index
    %139 = vector.load %arg6[%c0_82, %c6_83, %c0_84, %c0_85] : memref<1x10x8x128xf32, #tpu.memory_space<vmem>>, vector<1x1x8x128xf32>
    %140 = vector.shape_cast %139 : vector<1x1x8x128xf32> to vector<8x128xf32>
    %141 = vector.shape_cast %138 : vector<8x128xf32> to vector<1x1x8x128xf32>
    tpu.vector_store %arg6[%c0_82, %c6_83, %c0_84, %c0_85], %141 {strides = array<i32>} : memref<1x10x8x128xf32, #tpu.memory_space<vmem>>, vector<1x1x8x128xf32>,
    %c0_86 = arith.constant 0 : index
    %c7 = arith.constant 7 : index
    %c0_87 = arith.constant 0 : index
    %c0_88 = arith.constant 0 : index
    %142 = vector.load %arg6[%c0_86, %c7, %c0_87, %c0_88] : memref<1x10x8x128xf32, #tpu.memory_space<vmem>>, vector<1x1x8x128xf32>
    %143 = vector.shape_cast %142 : vector<1x1x8x128xf32> to vector<8x128xf32>
    %144 = vector.shape_cast %130 : vector<8x128xf32> to vector<1x8x128xf32>
    %cst_89 = arith.constant dense<0.000000e+00> : vector<8x128xf32>
    %145 = vector.multi_reduction <add>, %144, %cst_89 [0] : vector<1x8x128xf32> to vector<8x128xf32>
    %146 = arith.addf %143, %145 : vector<8x128xf32>
    %c0_90 = arith.constant 0 : index
    %c7_91 = arith.constant 7 : index
    %c0_92 = arith.constant 0 : index
    %c0_93 = arith.constant 0 : index
    %147 = vector.load %arg6[%c0_90, %c7_91, %c0_92, %c0_93] : memref<1x10x8x128xf32, #tpu.memory_space<vmem>>, vector<1x1x8x128xf32>
    %148 = vector.shape_cast %147 : vector<1x1x8x128xf32> to vector<8x128xf32>
    %149 = vector.shape_cast %146 : vector<8x128xf32> to vector<1x1x8x128xf32>
    tpu.vector_store %arg6[%c0_90, %c7_91, %c0_92, %c0_93], %149 {strides = array<i32>} : memref<1x10x8x128xf32, #tpu.memory_space<vmem>>, vector<1x1x8x128xf32>,
    %c0_94 = arith.constant 0 : index
    %c8 = arith.constant 8 : index
    %c0_95 = arith.constant 0 : index
    %c0_96 = arith.constant 0 : index
    %150 = vector.load %arg6[%c0_94, %c8, %c0_95, %c0_96] : memref<1x10x8x128xf32, #tpu.memory_space<vmem>>, vector<1x1x8x128xf32>
    %151 = vector.shape_cast %150 : vector<1x1x8x128xf32> to vector<8x128xf32>
    %152 = vector.shape_cast %132 : vector<8x128xf32> to vector<1x8x128xf32>
    %cst_97 = arith.constant dense<0.000000e+00> : vector<8x128xf32>
    %153 = vector.multi_reduction <add>, %152, %cst_97 [0] : vector<1x8x128xf32> to vector<8x128xf32>
    %154 = arith.addf %151, %153 : vector<8x128xf32>
    %c0_98 = arith.constant 0 : index
    %c8_99 = arith.constant 8 : index
    %c0_100 = arith.constant 0 : index
    %c0_101 = arith.constant 0 : index
    %155 = vector.load %arg6[%c0_98, %c8_99, %c0_100, %c0_101] : memref<1x10x8x128xf32, #tpu.memory_space<vmem>>, vector<1x1x8x128xf32>
    %156 = vector.shape_cast %155 : vector<1x1x8x128xf32> to vector<8x128xf32>
    %157 = vector.shape_cast %154 : vector<8x128xf32> to vector<1x1x8x128xf32>
    tpu.vector_store %arg6[%c0_98, %c8_99, %c0_100, %c0_101], %157 {strides = array<i32>} : memref<1x10x8x128xf32, #tpu.memory_space<vmem>>, vector<1x1x8x128xf32>,
    %c0_102 = arith.constant 0 : index
    %c9 = arith.constant 9 : index
    %c0_103 = arith.constant 0 : index
    %c0_104 = arith.constant 0 : index
    %158 = vector.load %arg6[%c0_102, %c9, %c0_103, %c0_104] : memref<1x10x8x128xf32, #tpu.memory_space<vmem>>, vector<1x1x8x128xf32>
    %159 = vector.shape_cast %158 : vector<1x1x8x128xf32> to vector<8x128xf32>
    %160 = vector.shape_cast %13 : vector<8x128xf32> to vector<1x8x128xf32>
    %cst_105 = arith.constant dense<0.000000e+00> : vector<8x128xf32>
    %161 = vector.multi_reduction <add>, %160, %cst_105 [0] : vector<1x8x128xf32> to vector<8x128xf32>
    %162 = arith.addf %159, %161 : vector<8x128xf32>
    %c0_106 = arith.constant 0 : index
    %c9_107 = arith.constant 9 : index
    %c0_108 = arith.constant 0 : index
    %c0_109 = arith.constant 0 : index
    %163 = vector.load %arg6[%c0_106, %c9_107, %c0_108, %c0_109] : memref<1x10x8x128xf32, #tpu.memory_space<vmem>>, vector<1x1x8x128xf32>
    %164 = vector.shape_cast %163 : vector<1x1x8x128xf32> to vector<8x128xf32>
    %165 = vector.shape_cast %162 : vector<8x128xf32> to vector<1x1x8x128xf32>
    tpu.vector_store %arg6[%c0_106, %c9_107, %c0_108, %c0_109], %165 {strides = array<i32>} : memref<1x10x8x128xf32, #tpu.memory_space<vmem>>, vector<1x1x8x128xf32>,
    return
  }
  func.func @transform_0(%arg0: i32, %arg1: i32) -> (i32, i32) {
    %c1_i32 = arith.constant 1 : i32
    %0 = arith.muli %arg0, %c1_i32 : i32
    %1 = arith.addi %0, %arg1 : i32
    %c0_i32 = arith.constant 0 : i32
    %2 = arith.minsi %1, %c0_i32 : i32
    %c0_i32_0 = arith.constant 0 : i32
    %c0_i32_1 = arith.constant 0 : i32
    return %2, %c0_i32_0 : i32, i32
  }
  func.func @transform_1(%arg0: i32, %arg1: i32) -> (i32, i32) {
    %c1_i32 = arith.constant 1 : i32
    %0 = arith.muli %arg0, %c1_i32 : i32
    %1 = arith.addi %0, %arg1 : i32
    %c0_i32 = arith.constant 0 : i32
    %2 = arith.minsi %1, %c0_i32 : i32
    %c0_i32_0 = arith.constant 0 : i32
    %c0_i32_1 = arith.constant 0 : i32
    return %2, %c0_i32_0 : i32, i32
  }
  func.func @transform_2(%arg0: i32, %arg1: i32) -> (i32, i32) {
    %c1_i32 = arith.constant 1 : i32
    %0 = arith.muli %arg0, %c1_i32 : i32
    %1 = arith.addi %0, %arg1 : i32
    %c0_i32 = arith.constant 0 : i32
    %2 = arith.minsi %1, %c0_i32 : i32
    %c0_i32_0 = arith.constant 0 : i32
    %c0_i32_1 = arith.constant 0 : i32
    return %2, %c0_i32_0 : i32, i32
  }
  func.func @transform_3(%arg0: i32, %arg1: i32) -> (i32, i32) {
    %c1_i32 = arith.constant 1 : i32
    %0 = arith.muli %arg0, %c1_i32 : i32
    %1 = arith.addi %0, %arg1 : i32
    %c0_i32 = arith.constant 0 : i32
    %2 = arith.minsi %1, %c0_i32 : i32
    %c0_i32_0 = arith.constant 0 : i32
    %c0_i32_1 = arith.constant 0 : i32
    return %2, %c0_i32_0 : i32, i32
  }
  func.func @transform_4(%arg0: i32, %arg1: i32) -> (i32, i32, i32, i32) {
    %c0_i32 = arith.constant 0 : i32
    %c0_i32_0 = arith.constant 0 : i32
    %c0_i32_1 = arith.constant 0 : i32
    %c0_i32_2 = arith.constant 0 : i32
    return %arg0, %c0_i32, %c0_i32_0, %c0_i32_1 : i32, i32, i32, i32
  }
}

</mosaic_0001>

<bundles_post_ra>
// kernel: tpu_custom_call.1
= control target key start
LH: loop header
LB: loop body
LE: loop exit
PB: predicated region body
PF: predicated region fallthrough
CT: control target
= control target key end

     0   :  { %9 = vsyncpa [#allocation3], 0  ;;  %s493_s0 = inlined_call_operand.hbm [shape: f32[8,128], index: 0, kind: input, shape index: {}]   ;;  %s494_s1 = inlined_call_operand.hbm [shape: f32[8,128], index: 1, kind: input, shape index: {}]   ;;  %s495_s2 = inlined_call_operand.hbm [shape: f32[8,128], index: 2, kind: input, shape index: {}]   ;;  %s496_s3 = inlined_call_operand.hbm [shape: f32[8,128], index: 3, kind: input, shape index: {}]   ;;  %s497_s4 = inlined_call_operand.hbm [shape: f32[1,10,8,128], index: 4, kind: output, shape index: {}]  }
   0x1   :  { %10 = vsyncpa [#allocation6], 0 }
   0x2   :  { %11 = vsyncpa [#allocation9], 0 }
   0x3   :  { %12 = vsyncpa [#allocation4], 0  ;;  %s408_s15 = smov [#allocation5]   ;;  %s409_s17 = smov [#allocation2]  }
   0x4   :  { %s39_s16 = sshll.u32 %s408_s15, 4  ;;  %s24_s18 = sshll.u32 %s409_s17, 4  ;;  %s40_s16 = int_to_ptr.vmem [resolvable:$true] %s39_s16  ;;  %s25_s18 = int_to_ptr.vmem [resolvable:$true] %s24_s18 }
   0x5   :  { %s308_s19 = scalar_lea.vmem %s40_s16, 128  ;;  %p313_p1 = scmp.lt.s32.totalorder %s40_s16, %s40_s16 }
   0x6   :  { %p309_p0 = scmp.ne.s32.totalorder %s40_s16, %s308_s19  ;;  %p314_p2 = scmp.lt.s32.totalorder %s308_s19, %s308_s19 }
   0x8   :  { %p315_p3 = por %p314_p2, %p313_p1 }
   0xa   :  { %p316_p4 = pnand %p315_p3, %p309_p0 }
   0xc   :  { %319 = shalt.err (!%p316_p4)
}
   0xd   :  { %42 = dma.hbm_to_vmem [thread:$0]  %s494_s1, 128, %s40_s16, [#allocation6]  }
   0xe   :  { %s328_s22 = scalar_lea.vmem %s25_s18, 128  ;;  %p333_p6 = scmp.lt.s32.totalorder %s25_s18, %s25_s18 }
   0xf   :  { %p329_p5 = scmp.ne.s32.totalorder %s25_s18, %s328_s22  ;;  %p334_p7 = scmp.lt.s32.totalorder %s328_s22, %s328_s22 }
  0x11   :  { %p335_p8 = por %p334_p7, %p333_p6 }
  0x13   :  { %p336_p9 = pnand %p335_p8, %p329_p5 }
  0x15   :  { %339 = shalt.err (!%p336_p9)
}
  0x16   :  { %27 = dma.hbm_to_vmem [thread:$0]  %s493_s0, 128, %s25_s18, [#allocation3]  }
  0x17   :  { %s410_s25 = smov [#allocation7]   ;;  %s411_s27 = smov [#allocation8]  }
  0x18   :  { %s54_s26 = sshll.u32 %s410_s25, 4  ;;  %s69_s28 = sshll.u32 %s411_s27, 4  ;;  %s55_s26 = int_to_ptr.vmem [resolvable:$true] %s54_s26  ;;  %s70_s28 = int_to_ptr.vmem [resolvable:$true] %s69_s28 }
  0x19   :  { %s348_s29 = scalar_lea.vmem %s55_s26, 128  ;;  %p353_p11 = scmp.lt.s32.totalorder %s55_s26, %s55_s26 }
  0x1a   :  { %p349_p10 = scmp.ne.s32.totalorder %s55_s26, %s348_s29  ;;  %p354_p12 = scmp.lt.s32.totalorder %s348_s29, %s348_s29 }
  0x1c   :  { %p355_p13 = por %p354_p12, %p353_p11 }
  0x1e   :  { %p356_p0 = pnand %p355_p13, %p349_p10 }
  0x20   :  { %359 = shalt.err (!%p356_p0)
}
  0x21   :  { %57 = dma.hbm_to_vmem [thread:$0]  %s495_s2, 128, %s55_s26, [#allocation6]  }
  0x22   :  { %s368_s5 = scalar_lea.vmem %s70_s28, 128  ;;  %p373_p2 = scmp.lt.s32.totalorder %s70_s28, %s70_s28 }
  0x23   :  { %p369_p1 = scmp.ne.s32.totalorder %s70_s28, %s368_s5  ;;  %p374_p3 = scmp.lt.s32.totalorder %s368_s5, %s368_s5 }
  0x25   :  { %p375_p4 = por %p374_p3, %p373_p2 }
  0x27   :  { %p376_p5 = pnand %p375_p4, %p369_p1 }
  0x29   :  { %379 = shalt.err (!%p376_p5)
}
  0x2a   :  { %72 = dma.hbm_to_vmem [thread:$0]  %s496_s3, 128, %s70_s28, [#allocation9]  }
  0x2b   :  { %400 = dma.done.wait [#allocation3], 128  }
  0x2c   :  { %401 = vsyncadd [#allocation3], 4294967168 }
  0x2d   :  { %402 = dma.done.wait [#allocation6], 256  }
  0x2e   :  { %403 = vsyncadd [#allocation6], 4294967040 }
  0x2f   :  { %404 = dma.done.wait [#allocation9], 128  }
  0x30   :  { %405 = vsyncadd [#allocation9], 4294967168  ;;  %v113_v0 = vlaneseq  ;;  %v120_v2 = vld [vmem:[#allocation2] sm:$0xff]  ;;  %v160_v3 = vld [vmem:[#allocation5] sm:$0xff]  ;;  %s412_s2 = smov [#allocation10]  }
  0x31   :  { %v111_v4 = vld [vmem:[#allocation8] sm:$0xff]  ;;  %v121_v5 = vand.u32 2147483647, %v120_v2  ;;  %v201_v6 = vld [vmem:[#allocation7] sm:$0xff]  ;;  %v161_v7 = vand.u32 2147483647, %v160_v3 }
  0x32   :  { %v452_v1 = vshrl.u32 %v113_v0, 7  ;;  %v202_v9 = vand.u32 2147483647, %v201_v6  ;;  %vm134_vm1 = vcmp.ge.f32.partialorder %v120_v2, 0.0  ;;  %v139_v25 = vmax.f32 %v120_v2, 0.0  ;;  %s252_s3 = sshll.u32 %s412_s2, 4  ;;  %s253_s3 = int_to_ptr.vmem [resolvable:$true] %s252_s3 }
  0x33   :  { %v122_v8 = vsub.f32 0.0, %v121_v5  ;;  %v162_v11 = vsub.f32 0.0, %v161_v7  ;;  %vm174_vm2 = vcmp.ge.f32.partialorder %v160_v3, 0.0  ;;  %v179_v28 = vmax.f32 %v160_v3, 0.0  ;;  %s380_s7 = scalar_lea.vmem %s253_s3, 1280  ;;  %p385_p7 = scmp.lt.s32.totalorder %s253_s3, %s253_s3 }
  0x34   :  { %vm118_vm0 = vcmp.lt.s32.totalorder %v452_v1, 4  ;;  %v203_v13 = vsub.f32 0.0, %v202_v9  ;;  %v220_v33 = vmax.f32 %v201_v6, 0.0  ;;  %vm215_vm3 = vcmp.ge.f32.partialorder %v201_v6, 0.0  ;;  %p381_p6 = scmp.ne.s32.totalorder %s253_s3, %s380_s7  ;;  %p386_p8 = scmp.lt.s32.totalorder %s380_s7, %s380_s7 }
  0x35   :  { %v457_v10 = vsel %vm118_vm0, %v111_v4, 0.0  ;;  %v123_v12 = vmul.f32 1.442695, %v122_v8  ;;  %v163_v14 = vmul.f32 1.442695, %v162_v11 }
  0x36   :  { %v204_v15 = vmul.f32 1.442695, %v203_v13  ;;  %246 = vst [vmem:[#allocation10 + $0x48] sm:$0xff] %v457_v10  ;;  %v140_v26 = vmul.f32 %v120_v2, %v457_v10  ;;  %v180_v29 = vmul.f32 %v160_v3, %v457_v10  ;;  %v221_v34 = vmul.f32 %v201_v6, %v457_v10  ;;  %p387_p9 = por %p386_p8, %p385_p7 }
  0x37   :  { %282 = vpow2.f32 %v123_v12 }
  0x38   :  { %284 = vpow2.f32 %v163_v14  ;;  %v141_v39 = vsub.f32 %v139_v25, %v140_v26  ;;  %v181_v44 = vsub.f32 %v179_v28, %v180_v29  ;;  %v222_v50 = vsub.f32 %v220_v33, %v221_v34  ;;  %p388_p10 = pnand %p387_p9, %p381_p6 }
  0x39   :  { %286 = vpow2.f32 %v204_v15 }
  0x44   :  { %v283_v16 = vpop.eup %282 }
  0x45   :  { %v285_v17 = vpop.eup %284  ;;  %v125_v18 = vadd.f32 1.0, %v283_v16  ;;  %v128_v22 = vmul.f32 -0.5, %v283_v16  ;;  %v131_v27 = vand.u32 2147483647, %v283_v16  ;;  %v135_v31 = vsel %vm134_vm1, 1.0, %v283_v16 }
  0x46   :  { %v287_v19 = vpop.eup %286  ;;  %v165_v20 = vadd.f32 1.0, %v285_v17  ;;  %v168_v23 = vmul.f32 -0.5, %v285_v17  ;;  %v171_v35 = vand.u32 2147483647, %v285_v17  ;;  %v175_v40 = vsel %vm174_vm2, 1.0, %v285_v17 }
  0x47   :  { %288 = vrcp.f32 %v125_v18  ;;  %v206_v21 = vadd.f32 1.0, %v287_v19  ;;  %v129_v24 = vadd.f32 1.0, %v128_v22  ;;  %v209_v30 = vmul.f32 -0.5, %v287_v19 }
  0x48   :  { %290 = vlog2.f32 %v125_v18  ;;  %v169_v32 = vadd.f32 1.0, %v168_v23  ;;  %v212_v36 = vand.u32 2147483647, %v287_v19  ;;  %vm463_vm4 = vcmp.lt.f32.partialorder %v131_v27, 0.0004427343 }
  0x49   :  { %292 = vrcp.f32 %v165_v20  ;;  %v130_v38 = vmul.f32 %v283_v16, %v129_v24  ;;  %v210_v45 = vadd.f32 1.0, %v209_v30  ;;  %v216_v49 = vsel %vm215_vm3, 1.0, %v287_v19 }
  0x4a   :  { %294 = vlog2.f32 %v165_v20  ;;  %v170_v48 = vmul.f32 %v285_v17, %v169_v32  ;;  %vm172_vm5 = vcmp.lt.f32.partialorder %v171_v35, 0.0004427343  ;;  %vm469_vm6 = vcmp.lt.f32.partialorder %v212_v36, 0.0004427343 }
  0x4b   :  { %296 = vrcp.f32 %v206_v21  ;;  %v211_v63 = vmul.f32 %v287_v19, %v210_v45 }
  0x4c   :  { %298 = vlog2.f32 %v206_v21 }
  0x54   :  { %v289_v37 = vpop.eup %288 }
  0x55   :  { %v291_v41 = vpop.eup %290  ;;  %v138_v42 = vmul.f32 %v289_v37, %v135_v31 }
  0x56   :  { %v293_v46 = vpop.eup %292  ;;  %v127_v47 = vmul.f32 0.6931472, %v291_v41 }
  0x57   :  { %v295_v51 = vpop.eup %294  ;;  %v143_v52 = vsel %vm118_vm0, %v138_v42, 0.0  ;;  %v178_v53 = vmul.f32 %v293_v46, %v175_v40 }
  0x58   :  { %v297_v55 = vpop.eup %296  ;;  %v146_v56 = vmul.f32 %v143_v52, %v457_v10  ;;  %v133_v57 = vsel %vm463_vm4, %v130_v38, %v127_v47  ;;  %v167_v58 = vmul.f32 0.6931472, %v295_v51  ;;  %154 = vst [vmem:[#allocation10 + $0x8] sm:$0xff] %v143_v52 }
  0x59   :  { %v299_v59 = vpop.eup %298  ;;  %v142_v60 = vadd.f32 %v141_v39, %v133_v57  ;;  %v183_v61 = vsel %vm118_vm0, %v178_v53, 0.0  ;;  %v219_v62 = vmul.f32 %v297_v55, %v216_v49 }
  0x5a   :  { %v187_v0 = vmul.f32 %v183_v61, %v457_v10  ;;  %v173_v2 = vsel %vm172_vm5, %v170_v48, %v167_v58  ;;  %v208_v6 = vmul.f32 0.6931472, %v299_v59  ;;  %149 = vst [vmem:[#allocation10] sm:$0xff] %v146_v56  ;;  %195 = vst [vmem:[#allocation10 + $0x20] sm:$0xff] %v183_v61 }
  0x5b   :  { %v144_v3 = vsel %vm118_vm0, %v142_v60, 0.0  ;;  %v182_v4 = vadd.f32 %v181_v44, %v173_v2  ;;  %v224_v5 = vsel %vm118_vm0, %v219_v62, 0.0 }
  0x5c   :  { %v228_v7 = vmul.f32 %v224_v5, %v457_v10  ;;  %v214_v9 = vsel %vm469_vm6, %v211_v63, %v208_v6  ;;  %159 = vst [vmem:[#allocation10 + $0x10] sm:$0xff] %v144_v3  ;;  %190 = vst [vmem:[#allocation10 + $0x18] sm:$0xff] %v187_v0 }
  0x5d   :  { %v184_v8 = vsel %vm118_vm0, %v182_v4, 0.0  ;;  %236 = vst [vmem:[#allocation10 + $0x38] sm:$0xff] %v224_v5  ;;  %v223_v11 = vadd.f32 %v222_v50, %v214_v9 }
  0x5e   :  { %200 = vst [vmem:[#allocation10 + $0x28] sm:$0xff] %v184_v8  ;;  %231 = vst [vmem:[#allocation10 + $0x30] sm:$0xff] %v228_v7 }
  0x5f   :  { %v225_v12 = vsel %vm118_vm0, %v223_v11, 0.0 }
  0x60   :  { %241 = vst [vmem:[#allocation10 + $0x40] sm:$0xff] %v225_v12 }
  0x61   :  { %391 = shalt.err (!%p388_p10)
}
  0x62   :  { %s413_s8 = smov 128   ;;  %s414_s9 = smov 8  }
  0x63   :  { %258 = dma.vmem_to_hbm [thread:$0]  %s253_s3, 1280, %s497_s4, [#allocation4], %s413_s8, %s413_s8, %s414_s9  }
  0x64   :  { %406 = dma.done.wait [#allocation4], 1280  }
  0x65   :  { %407 = vsyncadd [#allocation4], 4294966016 }
  0x66   :  { %262 = vsyncpa [#allocation3], 1 }
  0x67   :  { %263 = vsyncpa [#allocation6], 1 }
  0x68   :  { %264 = vsyncpa [#allocation9], 1 }
  0x69   :  { %265 = vsyncpa [#allocation4], 1 }

</bundles_post_ra>
